<compile_context>
chip_gen: v5e
topology: v5e:2x2
jax: 0.10.0
libtpu: 0.0.40
codegen_flags: <defaults>
</compile_context>

<pallas_src>
import math
import numpy as np
import jax
import jax.numpy as jnp
from jax.experimental import pallas as pl
from jax.experimental.pallas import tpu as pltpu

# ---------------------------------------------------------------- config ----
B = 16         # batch (small demo; wrapper handles any batch via padding)
C_EEG = 4      # EEG electrodes  (H in NCHW)
T = 16         # time samples    (W in NCHW)
KT = 5         # temporal kernel length
F1 = 8         # temporal filters
F2 = 8         # spatial filters
POOL = 4       # avg-pool window (time)
STRIDE = 2     # avg-pool stride (time)
E = 128        # CFG.eeg_embedding_dim
TC = T - KT + 1                    # 12   valid temporal-conv output length
TP = (TC - POOL) // STRIDE + 1     # 5    pooled length
CKT = C_EEG * KT                   # 20   im2col patch width
PW = 128                           # lane-padded pooled width (TP*F2=40 -> 128)
EPS = 1e-6                         # safe-log epsilon

# MXU operand dtype.  f32 keeps the module's reference numerics (Mosaic lowers
# f32 matmuls via multi-pass bf16, ~f32 accurate).  Set to jnp.bfloat16 on
# v5e/v6e to halve HBM->VMEM operand bytes (accumulation stays f32).
MXU_DTYPE = jnp.float32


# ---------------------------------------------------------------- kernel ----
def eeg_encoder_kernel(a_ref, wc_ref, bc_ref, wl_ref, bl_ref, out_ref,
                       pooled_ref):
    # a_ref:      (TC, TILE_B, CKT)  im2col patches, lane index = c*KT + k
    # wc_ref:     (CKT, F2)          fused temporal+spatial conv weight (dense)
    # bc_ref:     (1, F2)            fused conv bias
    # wl_ref:     (PW, E)            final linear weight, rows p*F2+g, 0-padded
    # bl_ref:     (1, E)
    # out_ref:    (TILE_B, E)        lane-dense output slab
    # pooled_ref: (TILE_B, PW)       f32 VMEM scratch (pooled + flattened)

    pooled_ref[...] = jnp.zeros_like(pooled_ref)    # keep padded lanes at 0

    # Temporal+spatial conv: one small MXU matmul per time position, reusing
    # the tiny dense (CKT, F2) weight (no kron block-diagonal operand).
    # TC is a small static constant -> fully unrolled.
    inv_pool = 1.0 / POOL
    sq = []
    for t in range(TC):
        h = jnp.dot(a_ref[t], wc_ref[...],
                    preferred_element_type=jnp.float32)      # (TILE_B, F2)
        h = h + bc_ref[...]
        sq.append(h * h)                                      # square (f32 VPU)

    # Average pool over time, accumulated straight into the padded lane slab.
    for p in range(TP):
        acc = sq[p * STRIDE]
        for j in range(1, POOL):
            acc = acc + sq[p * STRIDE + j]
        pooled_ref[:, p * F2:(p + 1) * F2] = acc * inv_pool

    # Safe log in f32 (EUP), then one lane-dense (TILE_B,PW)@(PW,E) matmul.
    # Padded lanes give log(EPS) but hit zero rows of wl -> no contribution.
    logp = jnp.log(jnp.maximum(pooled_ref[...], EPS))
    out_ref[...] = (jnp.dot(logp.astype(wl_ref.dtype), wl_ref[...],
                            preferred_element_type=jnp.float32)
                    + bl_ref[...]).astype(out_ref.dtype)


# --------------------------------------------------------------- wrapper ----
def _round_up(n, m):
    return ((n + m - 1) // m) * m


def eeg_encoder_forward(x, params, *, tile_b=256):
    """x: (B, 1, C_EEG, T) float32 (PyTorch NCHW).  Returns (B, E) float32.

    tile_b: batch rows per grid step.  Use 256 (v6e/v7x) / 128 (v5e) for real
    batches; any multiple of 8 works (batch is zero-padded to a multiple).
    """
    wt_t, bt, ws_t, bs, wl_t, bl = (params[k] for k in
                                    ("wt", "bt", "ws", "bs", "wl", "bl"))
    b_in = x.shape[0]
    tile_b = max(8, min(tile_b, _round_up(b_in, 8)))
    b_pad = _round_up(b_in, tile_b)
    n_steps = b_pad // tile_b

    # --- glue: im2col of the temporal conv, time-major so the kernel slices
    #     (TILE_B, CKT) planes off the leading (untiled) axis at zero cost.
    # TODO(synk): for realistic T (~1000) move the im2col into the kernel with
    # strided pl.ds reads to avoid duplicating the input KT-fold in HBM.
    xs = x[:, 0]                                                   # (B, C, T)
    cols = jnp.stack([xs[:, :, k:k + TC] for k in range(KT)], axis=-1)
    a = jnp.transpose(cols, (2, 0, 1, 3)).reshape(TC, b_in, CKT)   # (TC,B,CKT)
    if b_pad != b_in:
        a = jnp.pad(a, ((0, 0), (0, b_pad - b_in), (0, 0)))
    a = a.astype(MXU_DTYPE)

    # --- glue: fuse temporal + spatial conv weights (exact algebra) ---------
    wt = wt_t[:, 0, 0, :]                                          # (F1, KT)
    ws = ws_t[:, :, :, 0]                                          # (F2, F1, C)
    # wcomb[c*KT+k, g] = sum_f wt[f,k] * ws[g,f,c]   (tiny dense, reused per t)
    wcomb = jnp.einsum("fk,gfc->ckg", wt, ws).reshape(CKT, F2).astype(MXU_DTYPE)
    # fused bias: bcomb[g] = sum_{c,f} bt[f]*ws[g,f,c] + bs[g]
    bcomb = (jnp.einsum("f,gfc->g", bt, ws) + bs).reshape(1, F2).astype(jnp.float32)

    # --- glue: final linear weight, rows ordered p*F2+g, zero-padded to PW --
    # PyTorch flatten of (B, F2, 1, TP) is channel-major: column g*TP + p.
    wl2d = jnp.transpose(wl_t.reshape(E, F2, TP), (2, 1, 0)).reshape(TP * F2, E)
    wl_pad = jnp.pad(wl2d, ((0, PW - TP * F2), (0, 0))).astype(MXU_DTYPE)
    bl2d = bl.reshape(1, E).astype(jnp.float32)

    itm = jnp.dtype(MXU_DTYPE).itemsize
    flops = b_pad * (TC * 2 * CKT * F2 + 2 * PW * E)
    transcendentals = b_pad * PW
    bytes_accessed = (a.size * itm + wcomb.size * itm + wl_pad.size * itm
                      + bcomb.size * 4 + bl2d.size * 4 + b_pad * E * 4)

    out_pad = pl.pallas_call(
        eeg_encoder_kernel,
        out_shape=jax.ShapeDtypeStruct((b_pad, E), jnp.float32),
        grid_spec=pltpu.PrefetchScalarGridSpec(
            num_scalar_prefetch=0,
            grid=(n_steps,),
            in_specs=[
                # activations: blocked over the batch grid axis only
                pl.BlockSpec((TC, tile_b, CKT), lambda i: (0, i, 0)),
                # weights/biases: constant block index -> stay resident in VMEM
                pl.BlockSpec((CKT, F2), lambda i: (0, 0)),
                pl.BlockSpec((1, F2), lambda i: (0, 0)),
                pl.BlockSpec((PW, E), lambda i: (0, 0)),
                pl.BlockSpec((1, E), lambda i: (0, 0)),
            ],
            out_specs=pl.BlockSpec((tile_b, E), lambda i: (i, 0)),
            scratch_shapes=[pltpu.VMEM((tile_b, PW), jnp.float32)],
        ),
        compiler_params=pltpu.CompilerParams(
            # batch tiles are independent -> shard across TCs on v7x megacore
            dimension_semantics=("parallel",),
        ),
        cost_estimate=pl.CostEstimate(flops=flops,
                                      transcendentals=transcendentals,
                                      bytes_accessed=bytes_accessed),
    )(a, wcomb, bcomb, wl_pad, bl2d)
    return out_pad[:b_in]


# ------------------------------------------------------- pure-JAX reference -
def reference_forward(x, params):
    wt_t, bt, ws_t, bs, wl_t, bl = (params[k] for k in
                                    ("wt", "bt", "ws", "bs", "wl", "bl"))
    b = x.shape[0]
    dn = ("NCHW", "OIHW", "NCHW")
    h1 = jax.lax.conv_general_dilated(x, wt_t, (1, 1), "VALID",
                                      dimension_numbers=dn)
    h1 = h1 + bt[None, :, None, None]                  # (B, F1, C, TC)
    h2 = jax.lax.conv_general_dilated(h1, ws_t, (1, 1), "VALID",
                                      dimension_numbers=dn)
    h2 = h2 + bs[None, :, None, None]                  # (B, F2, 1, TC)
    h2 = h2 * h2
    pooled = jax.lax.reduce_window(h2, 0.0, jax.lax.add,
                                   (1, 1, 1, POOL), (1, 1, 1, STRIDE),
                                   "VALID") / POOL     # (B, F2, 1, TP)
    pooled = jnp.log(jnp.maximum(pooled, EPS))
    flat = pooled.reshape(b, F2 * TP)
    return flat @ wl_t.T + bl


# ------------------------------------------------------------------- main ---
if __name__ == "__main__":
    key = jax.random.PRNGKey(0)
    kx, k1, k2, k3, k4, k5, k6 = jax.random.split(key, 7)

    x = jax.random.normal(kx, (B, 1, C_EEG, T), jnp.float32)

    params = {
        # PyTorch-layout parameters of the wrapped eeg_classifier_model.
        "wt": jax.random.normal(k1, (F1, 1, 1, KT), jnp.float32) / math.sqrt(KT),
        "bt": jax.random.normal(k2, (F1,), jnp.float32) * 0.01,
        "ws": jax.random.normal(k3, (F2, F1, C_EEG, 1), jnp.float32)
              / math.sqrt(F1 * C_EEG),
        "bs": jax.random.normal(k4, (F2,), jnp.float32) * 0.01,
        "wl": jax.random.normal(k5, (E, F2 * TP), jnp.float32)
              / math.sqrt(F2 * TP),
        "bl": jax.random.normal(k6, (E,), jnp.float32) * 0.01,
    }

    # tile_b=8 keeps the small demo on a multi-step "parallel" batch grid;
    # use 128 (v5e) / 256 (v6e, v7x) for realistic batch sizes.
    out = eeg_encoder_forward(x, params, tile_b=8)
    out = jax.block_until_ready(out)

    ref = jax.block_until_ready(reference_forward(x, params))
    np.testing.assert_allclose(np.asarray(out), np.asarray(ref),
                               rtol=1e-3, atol=1e-3)
    assert out.shape == (B, E) and out.dtype == jnp.float32
    print("KERNEL_OK")
</pallas_src>

<mosaic_0001>
module attributes {stable_mosaic.version = 11 : i64} {
  func.func @eeg_encoder_kernel(%arg0: i32, %arg1: memref<12x8x20xf32, #tpu.memory_space<vmem>>, %arg2: memref<20x8xf32, #tpu.memory_space<vmem>>, %arg3: memref<1x8xf32, #tpu.memory_space<vmem>>, %arg4: memref<128x128xf32, #tpu.memory_space<vmem>>, %arg5: memref<1x128xf32, #tpu.memory_space<vmem>>, %arg6: memref<8x128xf32, #tpu.memory_space<vmem>>, %arg7: memref<8x128xf32, #tpu.memory_space<vmem>>) attributes {dimension_semantics = [#tpu.dimension_semantics<parallel>], iteration_bounds = array<i64: 2>, scalar_prefetch = 0 : i64, scratch_operands = 1 : i64, tpu.core_type = #tpu.core_type<tc>, window_params = [{transform_indices = @transform_0, window_bounds = array<i64: 12, 8, 20>}, {pipeline_mode = #tpu.pipeline_mode<synchronous>, transform_indices = @transform_1, window_bounds = array<i64: 20, 8>}, {pipeline_mode = #tpu.pipeline_mode<synchronous>, transform_indices = @transform_2, window_bounds = array<i64: 1, 8>}, {pipeline_mode = #tpu.pipeline_mode<synchronous>, transform_indices = @transform_3, window_bounds = array<i64: 128, 128>}, {pipeline_mode = #tpu.pipeline_mode<synchronous>, transform_indices = @transform_4, window_bounds = array<i64: 1, 128>}, {transform_indices = @transform_5, window_bounds = array<i64: 8, 128>}]} {
    %cst = arith.constant 0.000000e+00 : f32
    %0 = vector.broadcast %cst : f32 to vector<8x128xf32>
    %c0 = arith.constant 0 : index
    %c0_0 = arith.constant 0 : index
    %1 = vector.load %arg7[%c0, %c0_0] : memref<8x128xf32, #tpu.memory_space<vmem>>, vector<8x128xf32>
    tpu.vector_store %arg7[%c0, %c0_0], %0 {strides = array<i32>} : memref<8x128xf32, #tpu.memory_space<vmem>>, vector<8x128xf32>,
    %c0_1 = arith.constant 0 : index
    %c0_2 = arith.constant 0 : index
    %c0_3 = arith.constant 0 : index
    %2 = vector.load %arg1[%c0_1, %c0_2, %c0_3] : memref<12x8x20xf32, #tpu.memory_space<vmem>>, vector<1x8x20xf32>
    %3 = vector.shape_cast %2 : vector<1x8x20xf32> to vector<8x20xf32>
    %c0_4 = arith.constant 0 : index
    %c0_5 = arith.constant 0 : index
    %4 = vector.load %arg2[%c0_4, %c0_5] : memref<20x8xf32, #tpu.memory_space<vmem>>, vector<20x8xf32>
    %cst_6 = arith.constant dense<0.000000e+00> : vector<8x8xf32>
    %5 = tpu.matmul %3, %4, %cst_6 {dimension_numbers = #tpu.dot_dimension_numbers<[1], [0], [0], [1], [0, 0, 1, 1], [], []>} : vector<8x20xf32>, vector<20x8xf32>, vector<8x8xf32> -> vector<8x8xf32>
    %c0_7 = arith.constant 0 : index
    %c0_8 = arith.constant 0 : index
    %6 = vector.load %arg3[%c0_7, %c0_8] : memref<1x8xf32, #tpu.memory_space<vmem>>, vector<1x8xf32>
    %7 = vector.broadcast %6 : vector<1x8xf32> to vector<8x8xf32>
    %8 = arith.addf %5, %7 : vector<8x8xf32>
    %9 = arith.mulf %8, %8 : vector<8x8xf32>
    %c1 = arith.constant 1 : index
    %c0_9 = arith.constant 0 : index
    %c0_10 = arith.constant 0 : index
    %10 = vector.load %arg1[%c1, %c0_9, %c0_10] : memref<12x8x20xf32, #tpu.memory_space<vmem>>, vector<1x8x20xf32>
    %11 = vector.shape_cast %10 : vector<1x8x20xf32> to vector<8x20xf32>
    %c0_11 = arith.constant 0 : index
    %c0_12 = arith.constant 0 : index
    %12 = vector.load %arg2[%c0_11, %c0_12] : memref<20x8xf32, #tpu.memory_space<vmem>>, vector<20x8xf32>
    %cst_13 = arith.constant dense<0.000000e+00> : vector<8x8xf32>
    %13 = tpu.matmul %11, %12, %cst_13 {dimension_numbers = #tpu.dot_dimension_numbers<[1], [0], [0], [1], [0, 0, 1, 1], [], []>} : vector<8x20xf32>, vector<20x8xf32>, vector<8x8xf32> -> vector<8x8xf32>
    %c0_14 = arith.constant 0 : index
    %c0_15 = arith.constant 0 : index
    %14 = vector.load %arg3[%c0_14, %c0_15] : memref<1x8xf32, #tpu.memory_space<vmem>>, vector<1x8xf32>
    %15 = vector.broadcast %14 : vector<1x8xf32> to vector<8x8xf32>
    %16 = arith.addf %13, %15 : vector<8x8xf32>
    %17 = arith.mulf %16, %16 : vector<8x8xf32>
    %c2 = arith.constant 2 : index
    %c0_16 = arith.constant 0 : index
    %c0_17 = arith.constant 0 : index
    %18 = vector.load %arg1[%c2, %c0_16, %c0_17] : memref<12x8x20xf32, #tpu.memory_space<vmem>>, vector<1x8x20xf32>
    %19 = vector.shape_cast %18 : vector<1x8x20xf32> to vector<8x20xf32>
    %c0_18 = arith.constant 0 : index
    %c0_19 = arith.constant 0 : index
    %20 = vector.load %arg2[%c0_18, %c0_19] : memref<20x8xf32, #tpu.memory_space<vmem>>, vector<20x8xf32>
    %cst_20 = arith.constant dense<0.000000e+00> : vector<8x8xf32>
    %21 = tpu.matmul %19, %20, %cst_20 {dimension_numbers = #tpu.dot_dimension_numbers<[1], [0], [0], [1], [0, 0, 1, 1], [], []>} : vector<8x20xf32>, vector<20x8xf32>, vector<8x8xf32> -> vector<8x8xf32>
    %c0_21 = arith.constant 0 : index
    %c0_22 = arith.constant 0 : index
    %22 = vector.load %arg3[%c0_21, %c0_22] : memref<1x8xf32, #tpu.memory_space<vmem>>, vector<1x8xf32>
    %23 = vector.broadcast %22 : vector<1x8xf32> to vector<8x8xf32>
    %24 = arith.addf %21, %23 : vector<8x8xf32>
    %25 = arith.mulf %24, %24 : vector<8x8xf32>
    %c3 = arith.constant 3 : index
    %c0_23 = arith.constant 0 : index
    %c0_24 = arith.constant 0 : index
    %26 = vector.load %arg1[%c3, %c0_23, %c0_24] : memref<12x8x20xf32, #tpu.memory_space<vmem>>, vector<1x8x20xf32>
    %27 = vector.shape_cast %26 : vector<1x8x20xf32> to vector<8x20xf32>
    %c0_25 = arith.constant 0 : index
    %c0_26 = arith.constant 0 : index
    %28 = vector.load %arg2[%c0_25, %c0_26] : memref<20x8xf32, #tpu.memory_space<vmem>>, vector<20x8xf32>
    %cst_27 = arith.constant dense<0.000000e+00> : vector<8x8xf32>
    %29 = tpu.matmul %27, %28, %cst_27 {dimension_numbers = #tpu.dot_dimension_numbers<[1], [0], [0], [1], [0, 0, 1, 1], [], []>} : vector<8x20xf32>, vector<20x8xf32>, vector<8x8xf32> -> vector<8x8xf32>
    %c0_28 = arith.constant 0 : index
    %c0_29 = arith.constant 0 : index
    %30 = vector.load %arg3[%c0_28, %c0_29] : memref<1x8xf32, #tpu.memory_space<vmem>>, vector<1x8xf32>
    %31 = vector.broadcast %30 : vector<1x8xf32> to vector<8x8xf32>
    %32 = arith.addf %29, %31 : vector<8x8xf32>
    %33 = arith.mulf %32, %32 : vector<8x8xf32>
    %c4 = arith.constant 4 : index
    %c0_30 = arith.constant 0 : index
    %c0_31 = arith.constant 0 : index
    %34 = vector.load %arg1[%c4, %c0_30, %c0_31] : memref<12x8x20xf32, #tpu.memory_space<vmem>>, vector<1x8x20xf32>
    %35 = vector.shape_cast %34 : vector<1x8x20xf32> to vector<8x20xf32>
    %c0_32 = arith.constant 0 : index
    %c0_33 = arith.constant 0 : index
    %36 = vector.load %arg2[%c0_32, %c0_33] : memref<20x8xf32, #tpu.memory_space<vmem>>, vector<20x8xf32>
    %cst_34 = arith.constant dense<0.000000e+00> : vector<8x8xf32>
    %37 = tpu.matmul %35, %36, %cst_34 {dimension_numbers = #tpu.dot_dimension_numbers<[1], [0], [0], [1], [0, 0, 1, 1], [], []>} : vector<8x20xf32>, vector<20x8xf32>, vector<8x8xf32> -> vector<8x8xf32>
    %c0_35 = arith.constant 0 : index
    %c0_36 = arith.constant 0 : index
    %38 = vector.load %arg3[%c0_35, %c0_36] : memref<1x8xf32, #tpu.memory_space<vmem>>, vector<1x8xf32>
    %39 = vector.broadcast %38 : vector<1x8xf32> to vector<8x8xf32>
    %40 = arith.addf %37, %39 : vector<8x8xf32>
    %41 = arith.mulf %40, %40 : vector<8x8xf32>
    %c5 = arith.constant 5 : index
    %c0_37 = arith.constant 0 : index
    %c0_38 = arith.constant 0 : index
    %42 = vector.load %arg1[%c5, %c0_37, %c0_38] : memref<12x8x20xf32, #tpu.memory_space<vmem>>, vector<1x8x20xf32>
    %43 = vector.shape_cast %42 : vector<1x8x20xf32> to vector<8x20xf32>
    %c0_39 = arith.constant 0 : index
    %c0_40 = arith.constant 0 : index
    %44 = vector.load %arg2[%c0_39, %c0_40] : memref<20x8xf32, #tpu.memory_space<vmem>>, vector<20x8xf32>
    %cst_41 = arith.constant dense<0.000000e+00> : vector<8x8xf32>
    %45 = tpu.matmul %43, %44, %cst_41 {dimension_numbers = #tpu.dot_dimension_numbers<[1], [0], [0], [1], [0, 0, 1, 1], [], []>} : vector<8x20xf32>, vector<20x8xf32>, vector<8x8xf32> -> vector<8x8xf32>
    %c0_42 = arith.constant 0 : index
    %c0_43 = arith.constant 0 : index
    %46 = vector.load %arg3[%c0_42, %c0_43] : memref<1x8xf32, #tpu.memory_space<vmem>>, vector<1x8xf32>
    %47 = vector.broadcast %46 : vector<1x8xf32> to vector<8x8xf32>
    %48 = arith.addf %45, %47 : vector<8x8xf32>
    %49 = arith.mulf %48, %48 : vector<8x8xf32>
    %c6 = arith.constant 6 : index
    %c0_44 = arith.constant 0 : index
    %c0_45 = arith.constant 0 : index
    %50 = vector.load %arg1[%c6, %c0_44, %c0_45] : memref<12x8x20xf32, #tpu.memory_space<vmem>>, vector<1x8x20xf32>
    %51 = vector.shape_cast %50 : vector<1x8x20xf32> to vector<8x20xf32>
    %c0_46 = arith.constant 0 : index
    %c0_47 = arith.constant 0 : index
    %52 = vector.load %arg2[%c0_46, %c0_47] : memref<20x8xf32, #tpu.memory_space<vmem>>, vector<20x8xf32>
    %cst_48 = arith.constant dense<0.000000e+00> : vector<8x8xf32>
    %53 = tpu.matmul %51, %52, %cst_48 {dimension_numbers = #tpu.dot_dimension_numbers<[1], [0], [0], [1], [0, 0, 1, 1], [], []>} : vector<8x20xf32>, vector<20x8xf32>, vector<8x8xf32> -> vector<8x8xf32>
    %c0_49 = arith.constant 0 : index
    %c0_50 = arith.constant 0 : index
    %54 = vector.load %arg3[%c0_49, %c0_50] : memref<1x8xf32, #tpu.memory_space<vmem>>, vector<1x8xf32>
    %55 = vector.broadcast %54 : vector<1x8xf32> to vector<8x8xf32>
    %56 = arith.addf %53, %55 : vector<8x8xf32>
    %57 = arith.mulf %56, %56 : vector<8x8xf32>
    %c7 = arith.constant 7 : index
    %c0_51 = arith.constant 0 : index
    %c0_52 = arith.constant 0 : index
    %58 = vector.load %arg1[%c7, %c0_51, %c0_52] : memref<12x8x20xf32, #tpu.memory_space<vmem>>, vector<1x8x20xf32>
    %59 = vector.shape_cast %58 : vector<1x8x20xf32> to vector<8x20xf32>
    %c0_53 = arith.constant 0 : index
    %c0_54 = arith.constant 0 : index
    %60 = vector.load %arg2[%c0_53, %c0_54] : memref<20x8xf32, #tpu.memory_space<vmem>>, vector<20x8xf32>
    %cst_55 = arith.constant dense<0.000000e+00> : vector<8x8xf32>
    %61 = tpu.matmul %59, %60, %cst_55 {dimension_numbers = #tpu.dot_dimension_numbers<[1], [0], [0], [1], [0, 0, 1, 1], [], []>} : vector<8x20xf32>, vector<20x8xf32>, vector<8x8xf32> -> vector<8x8xf32>
    %c0_56 = arith.constant 0 : index
    %c0_57 = arith.constant 0 : index
    %62 = vector.load %arg3[%c0_56, %c0_57] : memref<1x8xf32, #tpu.memory_space<vmem>>, vector<1x8xf32>
    %63 = vector.broadcast %62 : vector<1x8xf32> to vector<8x8xf32>
    %64 = arith.addf %61, %63 : vector<8x8xf32>
    %65 = arith.mulf %64, %64 : vector<8x8xf32>
    %c8 = arith.constant 8 : index
    %c0_58 = arith.constant 0 : index
    %c0_59 = arith.constant 0 : index
    %66 = vector.load %arg1[%c8, %c0_58, %c0_59] : memref<12x8x20xf32, #tpu.memory_space<vmem>>, vector<1x8x20xf32>
    %67 = vector.shape_cast %66 : vector<1x8x20xf32> to vector<8x20xf32>
    %c0_60 = arith.constant 0 : index
    %c0_61 = arith.constant 0 : index
    %68 = vector.load %arg2[%c0_60, %c0_61] : memref<20x8xf32, #tpu.memory_space<vmem>>, vector<20x8xf32>
    %cst_62 = arith.constant dense<0.000000e+00> : vector<8x8xf32>
    %69 = tpu.matmul %67, %68, %cst_62 {dimension_numbers = #tpu.dot_dimension_numbers<[1], [0], [0], [1], [0, 0, 1, 1], [], []>} : vector<8x20xf32>, vector<20x8xf32>, vector<8x8xf32> -> vector<8x8xf32>
    %c0_63 = arith.constant 0 : index
    %c0_64 = arith.constant 0 : index
    %70 = vector.load %arg3[%c0_63, %c0_64] : memref<1x8xf32, #tpu.memory_space<vmem>>, vector<1x8xf32>
    %71 = vector.broadcast %70 : vector<1x8xf32> to vector<8x8xf32>
    %72 = arith.addf %69, %71 : vector<8x8xf32>
    %73 = arith.mulf %72, %72 : vector<8x8xf32>
    %c9 = arith.constant 9 : index
    %c0_65 = arith.constant 0 : index
    %c0_66 = arith.constant 0 : index
    %74 = vector.load %arg1[%c9, %c0_65, %c0_66] : memref<12x8x20xf32, #tpu.memory_space<vmem>>, vector<1x8x20xf32>
    %75 = vector.shape_cast %74 : vector<1x8x20xf32> to vector<8x20xf32>
    %c0_67 = arith.constant 0 : index
    %c0_68 = arith.constant 0 : index
    %76 = vector.load %arg2[%c0_67, %c0_68] : memref<20x8xf32, #tpu.memory_space<vmem>>, vector<20x8xf32>
    %cst_69 = arith.constant dense<0.000000e+00> : vector<8x8xf32>
    %77 = tpu.matmul %75, %76, %cst_69 {dimension_numbers = #tpu.dot_dimension_numbers<[1], [0], [0], [1], [0, 0, 1, 1], [], []>} : vector<8x20xf32>, vector<20x8xf32>, vector<8x8xf32> -> vector<8x8xf32>
    %c0_70 = arith.constant 0 : index
    %c0_71 = arith.constant 0 : index
    %78 = vector.load %arg3[%c0_70, %c0_71] : memref<1x8xf32, #tpu.memory_space<vmem>>, vector<1x8xf32>
    %79 = vector.broadcast %78 : vector<1x8xf32> to vector<8x8xf32>
    %80 = arith.addf %77, %79 : vector<8x8xf32>
    %81 = arith.mulf %80, %80 : vector<8x8xf32>
    %c10 = arith.constant 10 : index
    %c0_72 = arith.constant 0 : index
    %c0_73 = arith.constant 0 : index
    %82 = vector.load %arg1[%c10, %c0_72, %c0_73] : memref<12x8x20xf32, #tpu.memory_space<vmem>>, vector<1x8x20xf32>
    %83 = vector.shape_cast %82 : vector<1x8x20xf32> to vector<8x20xf32>
    %c0_74 = arith.constant 0 : index
    %c0_75 = arith.constant 0 : index
    %84 = vector.load %arg2[%c0_74, %c0_75] : memref<20x8xf32, #tpu.memory_space<vmem>>, vector<20x8xf32>
    %cst_76 = arith.constant dense<0.000000e+00> : vector<8x8xf32>
    %85 = tpu.matmul %83, %84, %cst_76 {dimension_numbers = #tpu.dot_dimension_numbers<[1], [0], [0], [1], [0, 0, 1, 1], [], []>} : vector<8x20xf32>, vector<20x8xf32>, vector<8x8xf32> -> vector<8x8xf32>
    %c0_77 = arith.constant 0 : index
    %c0_78 = arith.constant 0 : index
    %86 = vector.load %arg3[%c0_77, %c0_78] : memref<1x8xf32, #tpu.memory_space<vmem>>, vector<1x8xf32>
    %87 = vector.broadcast %86 : vector<1x8xf32> to vector<8x8xf32>
    %88 = arith.addf %85, %87 : vector<8x8xf32>
    %89 = arith.mulf %88, %88 : vector<8x8xf32>
    %c11 = arith.constant 11 : index
    %c0_79 = arith.constant 0 : index
    %c0_80 = arith.constant 0 : index
    %90 = vector.load %arg1[%c11, %c0_79, %c0_80] : memref<12x8x20xf32, #tpu.memory_space<vmem>>, vector<1x8x20xf32>
    %91 = vector.shape_cast %90 : vector<1x8x20xf32> to vector<8x20xf32>
    %c0_81 = arith.constant 0 : index
    %c0_82 = arith.constant 0 : index
    %92 = vector.load %arg2[%c0_81, %c0_82] : memref<20x8xf32, #tpu.memory_space<vmem>>, vector<20x8xf32>
    %cst_83 = arith.constant dense<0.000000e+00> : vector<8x8xf32>
    %93 = tpu.matmul %91, %92, %cst_83 {dimension_numbers = #tpu.dot_dimension_numbers<[1], [0], [0], [1], [0, 0, 1, 1], [], []>} : vector<8x20xf32>, vector<20x8xf32>, vector<8x8xf32> -> vector<8x8xf32>
    %c0_84 = arith.constant 0 : index
    %c0_85 = arith.constant 0 : index
    %94 = vector.load %arg3[%c0_84, %c0_85] : memref<1x8xf32, #tpu.memory_space<vmem>>, vector<1x8xf32>
    %95 = vector.broadcast %94 : vector<1x8xf32> to vector<8x8xf32>
    %96 = arith.addf %93, %95 : vector<8x8xf32>
    %97 = arith.mulf %96, %96 : vector<8x8xf32>
    %98 = arith.addf %9, %17 : vector<8x8xf32>
    %99 = arith.addf %98, %25 : vector<8x8xf32>
    %100 = arith.addf %99, %33 : vector<8x8xf32>
    %cst_86 = arith.constant 2.500000e-01 : f32
    %101 = vector.broadcast %cst_86 : f32 to vector<8x8xf32>
    %102 = arith.mulf %100, %101 : vector<8x8xf32>
    %c0_87 = arith.constant 0 : index
    %c0_88 = arith.constant 0 : index
    %103 = vector.load %arg7[%c0_87, %c0_88] : memref<8x128xf32, #tpu.memory_space<vmem>>, vector<8x8xf32>
    tpu.vector_store %arg7[%c0_87, %c0_88], %102 {strides = array<i32>} : memref<8x128xf32, #tpu.memory_space<vmem>>, vector<8x8xf32>,
    %104 = arith.addf %25, %33 : vector<8x8xf32>
    %105 = arith.addf %104, %41 : vector<8x8xf32>
    %106 = arith.addf %105, %49 : vector<8x8xf32>
    %cst_89 = arith.constant 2.500000e-01 : f32
    %107 = vector.broadcast %cst_89 : f32 to vector<8x8xf32>
    %108 = arith.mulf %106, %107 : vector<8x8xf32>
    %c0_90 = arith.constant 0 : index
    %c8_91 = arith.constant 8 : index
    %109 = vector.load %arg7[%c0_90, %c8_91] : memref<8x128xf32, #tpu.memory_space<vmem>>, vector<8x8xf32>
    tpu.vector_store %arg7[%c0_90, %c8_91], %108 {strides = array<i32>} : memref<8x128xf32, #tpu.memory_space<vmem>>, vector<8x8xf32>,
    %110 = arith.addf %41, %49 : vector<8x8xf32>
    %111 = arith.addf %110, %57 : vector<8x8xf32>
    %112 = arith.addf %111, %65 : vector<8x8xf32>
    %cst_92 = arith.constant 2.500000e-01 : f32
    %113 = vector.broadcast %cst_92 : f32 to vector<8x8xf32>
    %114 = arith.mulf %112, %113 : vector<8x8xf32>
    %c0_93 = arith.constant 0 : index
    %c16 = arith.constant 16 : index
    %115 = vector.load %arg7[%c0_93, %c16] : memref<8x128xf32, #tpu.memory_space<vmem>>, vector<8x8xf32>
    tpu.vector_store %arg7[%c0_93, %c16], %114 {strides = array<i32>} : memref<8x128xf32, #tpu.memory_space<vmem>>, vector<8x8xf32>,
    %116 = arith.addf %57, %65 : vector<8x8xf32>
    %117 = arith.addf %116, %73 : vector<8x8xf32>
    %118 = arith.addf %117, %81 : vector<8x8xf32>
    %cst_94 = arith.constant 2.500000e-01 : f32
    %119 = vector.broadcast %cst_94 : f32 to vector<8x8xf32>
    %120 = arith.mulf %118, %119 : vector<8x8xf32>
    %c0_95 = arith.constant 0 : index
    %c24 = arith.constant 24 : index
    %121 = vector.load %arg7[%c0_95, %c24] : memref<8x128xf32, #tpu.memory_space<vmem>>, vector<8x8xf32>
    tpu.vector_store %arg7[%c0_95, %c24], %120 {strides = array<i32>} : memref<8x128xf32, #tpu.memory_space<vmem>>, vector<8x8xf32>,
    %122 = arith.addf %73, %81 : vector<8x8xf32>
    %123 = arith.addf %122, %89 : vector<8x8xf32>
    %124 = arith.addf %123, %97 : vector<8x8xf32>
    %cst_96 = arith.constant 2.500000e-01 : f32
    %125 = vector.broadcast %cst_96 : f32 to vector<8x8xf32>
    %126 = arith.mulf %124, %125 : vector<8x8xf32>
    %c0_97 = arith.constant 0 : index
    %c32 = arith.constant 32 : index
    %127 = vector.load %arg7[%c0_97, %c32] : memref<8x128xf32, #tpu.memory_space<vmem>>, vector<8x8xf32>
    tpu.vector_store %arg7[%c0_97, %c32], %126 {strides = array<i32>} : memref<8x128xf32, #tpu.memory_space<vmem>>, vector<8x8xf32>,
    %c0_98 = arith.constant 0 : index
    %c0_99 = arith.constant 0 : index
    %128 = vector.load %arg7[%c0_98, %c0_99] : memref<8x128xf32, #tpu.memory_space<vmem>>, vector<8x128xf32>
    %cst_100 = arith.constant 9.99999997E-7 : f32
    %129 = vector.broadcast %cst_100 : f32 to vector<8x128xf32>
    %130 = arith.maximumf %128, %129 : vector<8x128xf32>
    %131 = math.log %130 : vector<8x128xf32>
    %c0_101 = arith.constant 0 : index
    %c0_102 = arith.constant 0 : index
    %132 = vector.load %arg4[%c0_101, %c0_102] : memref<128x128xf32, #tpu.memory_space<vmem>>, vector<128x128xf32>
    %cst_103 = arith.constant dense<0.000000e+00> : vector<8x128xf32>
    %133 = tpu.matmul %131, %132, %cst_103 {dimension_numbers = #tpu.dot_dimension_numbers<[1], [0], [0], [1], [0, 0, 1, 1], [], []>} : vector<8x128xf32>, vector<128x128xf32>, vector<8x128xf32> -> vector<8x128xf32>
    %c0_104 = arith.constant 0 : index
    %c0_105 = arith.constant 0 : index
    %134 = vector.load %arg5[%c0_104, %c0_105] : memref<1x128xf32, #tpu.memory_space<vmem>>, vector<1x128xf32>
    %135 = vector.broadcast %134 : vector<1x128xf32> to vector<8x128xf32>
    %136 = arith.addf %133, %135 : vector<8x128xf32>
    %c0_106 = arith.constant 0 : index
    %c0_107 = arith.constant 0 : index
    %137 = vector.load %arg6[%c0_106, %c0_107] : memref<8x128xf32, #tpu.memory_space<vmem>>, vector<8x128xf32>
    tpu.vector_store %arg6[%c0_106, %c0_107], %136 {strides = array<i32>} : memref<8x128xf32, #tpu.memory_space<vmem>>, vector<8x128xf32>,
    return
  }
  func.func @transform_0(%arg0: i32) -> (i32, i32, i32) {
    %c0_i32 = arith.constant 0 : i32
    %c0_i32_0 = arith.constant 0 : i32
    %c0_i32_1 = arith.constant 0 : i32
    return %c0_i32, %arg0, %c0_i32_0 : i32, i32, i32
  }
  func.func @transform_1(%arg0: i32) -> (i32, i32) {
    %c0_i32 = arith.constant 0 : i32
    %c0_i32_0 = arith.constant 0 : i32
    %c0_i32_1 = arith.constant 0 : i32
    return %c0_i32, %c0_i32_0 : i32, i32
  }
  func.func @transform_2(%arg0: i32) -> (i32, i32) {
    %c0_i32 = arith.constant 0 : i32
    %c0_i32_0 = arith.constant 0 : i32
    %c0_i32_1 = arith.constant 0 : i32
    return %c0_i32, %c0_i32_0 : i32, i32
  }
  func.func @transform_3(%arg0: i32) -> (i32, i32) {
    %c0_i32 = arith.constant 0 : i32
    %c0_i32_0 = arith.constant 0 : i32
    %c0_i32_1 = arith.constant 0 : i32
    return %c0_i32, %c0_i32_0 : i32, i32
  }
  func.func @transform_4(%arg0: i32) -> (i32, i32) {
    %c0_i32 = arith.constant 0 : i32
    %c0_i32_0 = arith.constant 0 : i32
    %c0_i32_1 = arith.constant 0 : i32
    return %c0_i32, %c0_i32_0 : i32, i32
  }
  func.func @transform_5(%arg0: i32) -> (i32, i32) {
    %c0_i32 = arith.constant 0 : i32
    %c0_i32_0 = arith.constant 0 : i32
    return %arg0, %c0_i32 : i32, i32
  }
}

</mosaic_0001>

<bundles_post_ra>
// kernel: tpu_custom_call.1
= control target key start
LH: loop header
LB: loop body
LE: loop exit
PB: predicated region body
PF: predicated region fallthrough
CT: control target
= control target key end

     0   :  { %s1258_s0 = inlined_call_operand.hbm [shape: f32[12,16,20], index: 0, kind: input, shape index: {}]   ;;  %s1259_s1 = inlined_call_operand.vmem [shape: f32[20,8], index: 1, kind: input, shape index: {}]   ;;  %s1260_s2 = inlined_call_operand.vmem [shape: f32[1,8], index: 2, kind: input, shape index: {}]   ;;  %s1261_s3 = inlined_call_operand.hbm [shape: f32[128,128], index: 3, kind: input, shape index: {}]   ;;  %s1262_s4 = inlined_call_operand.vmem [shape: f32[1,128], index: 4, kind: input, shape index: {}]   ;;  %s1263_s5 = inlined_call_operand.hbm [shape: f32[16,128], index: 5, kind: output, shape index: {}]  }
   0x1   :  { %1266 = sst [smem:[#allocation12_spill]] %s1261_s3 }
   0x2   :  { %10 = vsyncpa [#allocation4], 0 }
   0x3   :  { %12 = vsyncpa [#allocation4 + $0x1], 0 }
   0x4   :  { %13 = vsyncpa [#allocation7], 0 }
   0x5   :  { %14 = vsyncpa [#allocation5], 0 }
   0x6   :  { %16 = vsyncpa [#allocation5 + $0x1], 0  ;;  %s1061_s18 = smov 0   ;;  %s1063_s19 = smov 0  }
   0x7   :  { %s1065_s20 = smov 0   ;;  %s1067_s21 = smov 0  }
   0x8 LB: > { %s1082_s22 = sadd.s32 4294967295, %s1020_s21   ;;  %s772_s23 = sadd.s32 4294967294, %s1020_s21   ;;  %s1020_s21 = sphi %s1067_s21, %s1279_s21   ;;  %s1016_s20 = sphi %s1065_s20, %s1278_s20   ;;  %s1012_s19 = sphi %s1063_s19, %s1277_s19   ;;  %s1008_s18 = sphi %s1061_s18, %s1276_s18  }
   0x9   : > { %p42_p0 = scmp.ne.s32.totalorder %s1012_s19, %s1008_s18  ;;  %p43_p1 = scmp.eq.s32.totalorder %s1082_s22, 0 }
   0xa   : > { %p150_p2 = scmp.eq.s32.totalorder %s1082_s22, 1  ;;  %p156_p3 = scmp.eq.s32.totalorder %s772_s23, 1 }
   0xb   : > { %p1091_p4 = por %p43_p1, %p42_p0  ;;  %p773_p5 = scmp.ge.s32.totalorder %s1020_s21, 1 }
   0xc   : > { %p1096_p6 = por %p156_p3, %p42_p0  ;;  %p163_p7 = scmp.lt.s32.totalorder %s1020_s21, 3 }
   0xd   : > { %s1269_s3 = sld [smem:[#allocation12_spill]]  ;;  %s1022_s30 = smov [#allocation6]  }
   0xe   : > { %p1104_p8 = pnand %p773_p5, %p163_p7  ;;  %s182_s6 = sshll.u32 %s1022_s30, 4  ;;  %s183_s6 = int_to_ptr.vmem [resolvable:$true] %s182_s6 }
   0xf   : > { %s1114_s7 = sadd.s32 1, %s1020_s21   ;;  %s1264_s8 = smov 128  }
  0x10   : > { %p829_p9 = pneg %p1104_p8  ;;  %s1265_s9 = smov 8  }
  0x11   : > { %s26_s10 = ssub.s32 %s1020_s21, %s1114_s7  ;;  %s29_s11 = sadd.s32 1, %s1016_s20 }
  0x12   : > { %p830_p10 = pnand %p829_p9, %p43_p1  ;;  %p27_p12 = scmp.eq.s32.totalorder %s26_s10, 0 }
  0x13   : > { %s180_s28 = sshll.u32 %s1269_s3, 4  ;;  %p36_p13 = scmp.ne.s32.totalorder %s1016_s20, %s1012_s19  ;;  %s181_s28 = int_to_ptr.hbm [resolvable:$true] %s180_s28 }
  0x14   : > { %832 = dma.hbm_to_vmem [thread:$0]  (!%p830_p10), %s181_s28, 2048, %s183_s6, [#allocation7], %s1264_s8, %s1264_s8, %s1265_s9  }
  0x15   : > { %p37_p0 = scmp.eq.s32.totalorder %s1020_s21, 0  ;;  %p842_p3 = scmp.lt.s32.totalorder %s1020_s21, 2 }
  0x16   : > { %s1127_s12 = scalar_select %p27_p12, %s1016_s20, %s29_s11  }
  0x17   : > { %p38_p5 = por %p37_p0, %p36_p13  ;;  %p1131_p7 = por %p150_p2, %p36_p13 }
  0x18   : > { %s199_s14 = sand.u32 1, %s1016_s20   ;;  %s776_s15 = sshll.u32 %s1020_s21, 3 }
  0x19   : > { %s819_s16 = smul.u32 96, %s199_s14  ;;  %s207_s26 = scalar_lea.hbm %s1258_s0, %s776_s15 }
  0x1a   : > { %p1140_p9 = pnand %p842_p3, %p38_p5  ;;  %s208_s28 = sshll.u32 %s207_s26, 4  ;;  %s209_s28 = int_to_ptr.hbm [resolvable:$true] %s208_s28 }
  0x1b   : > { %s203_s30 = scalar_lea.vmem [#allocation3], %s819_s16  ;;  %s200_s10 = scalar_lea.sflag [#allocation4], %s199_s14 }
  0x1c   : > { %s210_s6 = sshll.u32 %s203_s30, 4  ;;  %s920_s11 = sshra.s32 %s209_s28, 4  ;;  %s211_s6 = int_to_ptr.vmem [resolvable:$true] %s210_s6  ;;  %s921_s11 = int_to_ptr.hbm [resolvable:$true] %s920_s11 }
  0x1d   : > { %s922_s8 = scalar_lea.hbm %s921_s11, 96  ;;  %p924_p10 = pneg %p1140_p9 }
  0x1e   : > { %p923_p2 = scmp.ne.s32.totalorder %s921_s11, %s922_s8  ;;  %s927_s23 = scalar_lea.hbm %s1258_s0, 192 }
  0x1f   : > { %p928_p0 = scmp.lt.s32.totalorder %s921_s11, %s1258_s0  ;;  %p929_p3 = scmp.lt.s32.totalorder %s927_s23, %s922_s8 }
  0x20   : > { %p925_p12 = pnand %p924_p10, %p923_p2 }
  0x21   : > { %p930_p5 = por %p929_p3, %p928_p0 }
  0x22   : > { %p926_p13 = pneg %p925_p12 }
  0x24   : > { %p931_p11 = pnand %p930_p5, %p926_p13 }
  0x26   : > { %934 = shalt.err (!%p931_p11)
}
  0x27   : > { %s1025_s14 = smov 256   ;;  %s1273_s16 = smov 8  }
  0x28   : > { %s1274_s26 = smov 128   ;;  %222 = sbr.rel (%p1104_p8) target bundleno = 490 (0x1ea), region = 40 }
  0x29   : > { %836 = dma.hbm_to_vmem [thread:$0]  (!%p1140_p9), %s209_s28, 1536, %s211_s6, %s200_s10, %s1025_s14, %s1274_s26, %s1273_s16  }
  0x2a   : > { %s1159_s30 = sand.u32 (!%p1104_p8), 1, %s1012_s19  }
  0x2b   : > { %s820_s3 = smul.u32 (!%p1104_p8), 96, %s1159_s30  ;;  %s225_s8 = scalar_lea.sflag (!%p1104_p8), [#allocation4], %s1159_s30 }
  0x2d   : > { %s1163_s9 = scalar_lea.vmem [#allocation3], %s820_s3 }
  0x2e   : > { %995 = dma.done.wait (%p1091_p4), %s225_s8, 1536  }
  0x2f   : > { %997 = vsyncadd (%p1091_p4), %s225_s8, 4294965760 }
  0x30   : > { %999 = dma.done.wait (%p43_p1), [#allocation7], 2048  }
  0x31   : > { %1001 = vsyncadd (%p43_p1), [#allocation7], 4294965248  ;;  %vm274_vm0 = vcmask 1043456   ;;  %v265_v0 = vld [vmem:[%s1259_s1 + $0x10] sm:$0xf]  ;;  %v264_v1 = vld [vmem:[%s1259_s1 + $0x8] sm:$0xff] }
  0x32   : > { %780 = vmatpush.msk.msra.mxu1 %vm274_vm0, %v265_v0  ;;  %786 = vmatpush.msk.msra.mxu2 %vm274_vm0, %v265_v0  ;;  %v263_v2 = vld [vmem:[%s1259_s1] sm:$0xff]  ;;  %v262_v3 = vld [vmem:[%s1163_s9] sm:$0xff]  ;;  %vm270_vm1 = vcmask 162816   ;;  %v785_v4 = vld [vmem:[%s1163_s9 + $0x10] sm:$0xff]  ;;  %v1026_v15 = vmov 0.0   ;;  %vm589_vm2 = vcmask 64512  }
  0x33   : > { %789 = vmatpush.msk.msra.mxu3 %vm274_vm0, %v265_v0  ;;  %v788_v5 = vld [vmem:[%s1163_s9 + $0x18] sm:$0xff]  ;;  %v782_v6 = vld [vmem:[%s1163_s9 + $0x8] sm:$0xff]  ;;  %v791_v7 = vld [vmem:[%s1163_s9 + $0x20] sm:$0xff]  ;;  %261 = vst [vmem:[#allocation2] sm:$0xff] %v1026_v15  ;;  %s1027_s17 = smov 8   ;;  %s1028_s23 = smov 16  }
  0x34   : > { %292 = vmatpush.msra.mxu1 %v264_v1  ;;  %344 = vmatpush.msra.mxu2 %v264_v1  ;;  %v800_v8 = vld [vmem:[%s1163_s9 + $0x38] sm:$0xff]  ;;  %v794_v9 = vld [vmem:[%s1163_s9 + $0x28] sm:$0xff]  ;;  %v797_v10 = vld [vmem:[%s1163_s9 + $0x30] sm:$0xff]  ;;  %s1029_s14 = smov 24   ;;  %s1030_s16 = smov 32   ;;  %vm599_vm3 = vcmask 130112  }
  0x35   : > { %370 = vmatpush.msra.mxu3 %v264_v1  ;;  %v803_v11 = vld [vmem:[%s1163_s9 + $0x40] sm:$0xff]  ;;  %v806_v12 = vld [vmem:[%s1163_s9 + $0x48] sm:$0xff]  ;;  %v809_v13 = vld [vmem:[%s1163_s9 + $0x50] sm:$0xff]  ;;  %vm609_vm4 = vcmask 195712   ;;  %vm619_vm5 = vcmask 261312   ;;  %vm629_vm6 = vcmask 326912  }
  0x36   : > { %293 = vmatpush.msra.mxu1 %v263_v2  ;;  %345 = vmatpush.msra.mxu2 %v263_v2  ;;  %v812_v14 = vld [vmem:[%s1163_s9 + $0x58] sm:$0xff]  ;;  %v644_v15 = vld [vmem:[#allocation6 + $0x48] sm:$0xff]  ;;  %s779_s26 = sshll.u32 %s1159_s30, 3  ;;  %s816_s3 = sshll.u32 %s1082_s22, 3 }
  0x37   : > { %371 = vmatpush.msra.mxu3 %v263_v2  ;;  %781 = vmatmul.msk.f32.vlgmr.msra.gmra.mxu1 %vm270_vm1, %v262_v3  ;;  %v886_v17 = vld [vmem:[%s1260_s2] ss:$0 sm:$0xff]  ;;  %s687_s29 = scalar_lea.hbm %s1263_s5, %s816_s3  ;;  %s260_s6 = scalar_lea.vmem [#allocation8], %s779_s26 }
  0x38   : > { %787 = vmatmul.msk.f32.vlgmr.msra.gmra.mxu2 %vm270_vm1, %v785_v4  ;;  %790 = vmatmul.msk.f32.vlgmr.msra.gmra.mxu3 %vm270_vm1, %v788_v5  ;;  %s689_s24 = sshll.u32 %s260_s6, 4  ;;  %s691_s10 = sshll.u32 %s687_s29, 4  ;;  %s690_s24 = int_to_ptr.vmem [resolvable:$true] %s689_s24  ;;  %s692_s10 = int_to_ptr.hbm [resolvable:$true] %s691_s10 }
  0x39   : > { %792 = vmatpush.msk.msrb.mxu2 %vm274_vm0, %v265_v0  ;;  %783 = vmatpush.msk.msrb.mxu1 %vm274_vm0, %v265_v0  ;;  %s677_s11 = scalar_lea.sflag [#allocation5], %s1159_s30  ;;  %s964_s15 = sshra.s32 %s692_s10, 4  ;;  %s965_s15 = int_to_ptr.hbm [resolvable:$true] %s964_s15 }
  0x3a   : > { %801 = vmatpush.msk.msrb.mxu3 %vm274_vm0, %v265_v0  ;;  %s966_s22 = scalar_lea.hbm %s965_s15, 8  ;;  %p971_p11 = scmp.lt.s32.totalorder %s965_s15, %s1263_s5 }
  0x3b   : > { %396 = vmatpush.msrb.mxu2 %v264_v1  ;;  %318 = vmatpush.msrb.mxu1 %v264_v1  ;;  %p967_p1 = scmp.ne.s32.totalorder %s965_s15, %s966_s22 }
  0x3c   : > { %474 = vmatpush.msrb.mxu3 %v264_v1 }
  0x3d   : > { %397 = vmatpush.msrb.mxu2 %v263_v2  ;;  %319 = vmatpush.msrb.mxu1 %v263_v2  ;;  %p968_p4 = pnand %p967_p1, %p1131_p7 }
  0x3e   : > { %475 = vmatpush.msrb.mxu3 %v263_v2 }
  0x3f   : > { %798 = vmatpush.msk.msra.mxu2 %vm274_vm0, %v265_v0  ;;  %784 = vmatmul.msk.f32.vlgmr.msrb.gmra.mxu1 %vm270_vm1, %v782_v6  ;;  %p969_p8 = pneg %p968_p4 }
  0x40   : > { %804 = vmatpush.msk.msra.mxu3 %vm274_vm0, %v265_v0  ;;  %793 = vmatmul.msk.f32.vlgmr.msrb.gmra.mxu2 %vm270_vm1, %v791_v7 }
  0x41   : > { %795 = vmatpush.msk.msra.mxu1 %vm274_vm0, %v265_v0  ;;  %802 = vmatmul.msk.f32.vlgmr.msrb.gmra.mxu3 %vm270_vm1, %v800_v8 }
  0x42   : > { %448 = vmatpush.msra.mxu2 %v264_v1  ;;  %500 = vmatpush.msra.mxu3 %v264_v1 }
  0x43   : > { %422 = vmatpush.msra.mxu1 %v264_v1 }
  0x44   : > { %449 = vmatpush.msra.mxu2 %v263_v2  ;;  %501 = vmatpush.msra.mxu3 %v263_v2 }
  0x45   : > { %423 = vmatpush.msra.mxu1 %v263_v2 }
  0x46   : > { %810 = vmatpush.msk.msrb.mxu2 %vm274_vm0, %v265_v0  ;;  %813 = vmatpush.msk.msrb.mxu3 %vm274_vm0, %v265_v0 }
  0x47   : > { %807 = vmatpush.msk.msrb.mxu1 %vm274_vm0, %v265_v0 }
  0x48   : > { %796 = vmatmul.msk.f32.vlgmr.msra.gmra.mxu1 %vm270_vm1, %v794_v9  ;;  %552 = vmatpush.msrb.mxu2 %v264_v1  ;;  %v650_v9 = vld [vmem:[#allocation6 + $0x78] sm:$0xff] }
  0x49   : > { %799 = vmatmul.msk.f32.vlgmr.msra.gmra.mxu2 %vm270_vm1, %v797_v10  ;;  %526 = vmatpush.msrb.mxu1 %v264_v1  ;;  %v649_v10 = vld [vmem:[#allocation6 + $0x70] sm:$0xff] }
  0x4a   : > { %805 = vmatmul.msk.f32.vlgmr.msra.gmra.mxu3 %vm270_vm1, %v803_v11  ;;  %553 = vmatpush.msrb.mxu2 %v263_v2  ;;  %v648_v11 = vld [vmem:[#allocation6 + $0x68] sm:$0xff] }
  0x4b   : > { %527 = vmatpush.msrb.mxu1 %v263_v2  ;;  %578 = vmatpush.msrb.mxu3 %v264_v1 }
  0x4c   : > { %655 = vmatpush.msra.mxu0 %v650_v9 }
  0x4d   : > { %579 = vmatpush.msrb.mxu3 %v263_v2 }
  0x4e   : > { %656 = vmatpush.msra.mxu0 %v649_v10 }
  0x50   : > { %808 = vmatmul.msk.f32.vlgmr.msrb.gmra.mxu1 %vm270_vm1, %v806_v12  ;;  %657 = vmatpush.msra.mxu0 %v648_v11  ;;  %v647_v12 = vld [vmem:[#allocation6 + $0x60] sm:$0xff] }
  0x51   : > { %811 = vmatmul.msk.f32.vlgmr.msrb.gmra.mxu2 %vm270_vm1, %v809_v13  ;;  %v646_v13 = vld [vmem:[#allocation6 + $0x58] sm:$0xff] }
  0x52   : > { %814 = vmatmul.msk.f32.vlgmr.msrb.gmra.mxu3 %vm270_vm1, %v812_v14  ;;  %658 = vmatpush.msra.mxu0 %v647_v12  ;;  %v645_v14 = vld [vmem:[#allocation6 + $0x50] sm:$0xff] }
  0x54   : > { %659 = vmatpush.msra.mxu0 %v646_v13 }
  0x56   : > { %660 = vmatpush.msra.mxu0 %v645_v14 }
  0x58   : > { %661 = vmatpush.msra.mxu0 %v644_v15 }
  0xb4   : > { %v295_v16 = vpop.f32.mrf.mxu1 }
  0xb5   : > { %v296_v18 = vadd.f32 %v886_v17, %v295_v16  ;;  %v643_v16 = vld [vmem:[#allocation6 + $0x40] sm:$0xff] }
  0xb6   : > { %662 = vmatpush.msra.mxu0 %v643_v16 }
  0xb7   : > { %v298_v25 = vmul.f32 %v296_v18, %v296_v18  ;;  %v641_v18 = vld [vmem:[#allocation6 + $0x30] sm:$0xff] }
  0xbb   : > { %v347_v19 = vpop.f32.mrf.mxu2  ;;  %v373_v20 = vpop.f32.mrf.mxu3 }
  0xbc   : > { %v321_v21 = vpop.f32.mrf.mxu1  ;;  %v348_v22 = vadd.f32 %v886_v17, %v347_v19  ;;  %v374_v24 = vadd.f32 %v886_v17, %v373_v20  ;;  %v640_v19 = vld [vmem:[#allocation6 + $0x28] sm:$0xff]  ;;  %v639_v20 = vld [vmem:[#allocation6 + $0x20] sm:$0xff] }
  0xbd   : > { %v322_v23 = vadd.f32 %v886_v17, %v321_v21  ;;  %v638_v21 = vld [vmem:[#allocation6 + $0x18] sm:$0xff] }
  0xbe   : > { %v350_v27 = vmul.f32 %v348_v22, %v348_v22  ;;  %v376_v29 = vmul.f32 %v374_v24, %v374_v24  ;;  %v637_v22 = vld [vmem:[#allocation6 + $0x10] sm:$0xff]  ;;  %v636_v24 = vld [vmem:[#allocation6 + $0x8] sm:$0xff] }
  0xbf   : > { %v324_v26 = vmul.f32 %v322_v23, %v322_v23 }
  0xc0   : > { %v591_v37 = vadd.f32 %v376_v29, %v350_v27 }
  0xc1   : > { %v585_v28 = vadd.f32 %v324_v26, %v298_v25  ;;  %v635_v25 = vld [vmem:[#allocation6] sm:$0xff] }
  0xc3   : > { %v586_v30 = vadd.f32 %v585_v28, %v350_v27  ;;  %v399_v31 = vpop.f32.mrf.mxu2 }
  0xc4   : > { %v400_v32 = vadd.f32 %v886_v17, %v399_v31  ;;  %v477_v34 = vpop.f32.mrf.mxu3 }
  0xc5   : > { %v425_v33 = vpop.f32.mrf.mxu1  ;;  %v587_v35 = vadd.f32 %v586_v30, %v376_v29  ;;  %v478_v42 = vadd.f32 %v886_v17, %v477_v34 }
  0xc6   : > { %v426_v36 = vadd.f32 %v886_v17, %v425_v33  ;;  %v402_v38 = vmul.f32 %v400_v32, %v400_v32  ;;  %v887_v33 = vld [vmem:[%s1262_s4] ss:$0 sm:$0xff] }
  0xc7   : > { %v588_v39 = vmul.f32 0.25, %v587_v35  ;;  %v480_v51 = vmul.f32 %v478_v42, %v478_v42 }
  0xc8   : > { %v428_v40 = vmul.f32 %v426_v36, %v426_v36  ;;  %v592_v41 = vadd.f32 %v591_v37, %v402_v38 }
  0xc9   : > { %590 = vst.msk [vmem:[#allocation2] sm:$0xff] %vm589_vm2, %v588_v39 }
  0xca   : > { %v593_v43 = vadd.f32 %v592_v41, %v428_v40  ;;  %v601_v50 = vadd.f32 %v428_v40, %v402_v38 }
  0xcc   : > { %v451_v44 = vpop.f32.mrf.mxu2  ;;  %v594_v48 = vmul.f32 0.25, %v593_v43 }
  0xcd   : > { %v452_v45 = vadd.f32 %v886_v17, %v451_v44  ;;  %v503_v46 = vpop.f32.mrf.mxu3  ;;  %v529_v47 = vpop.f32.mrf.mxu1 }
  0xce   : > { %v504_v49 = vadd.f32 %v886_v17, %v503_v46  ;;  %v530_v53 = vadd.f32 %v886_v17, %v529_v47  ;;  %596 = vrot.lane.b32.xlu0 %v594_v48, %s1027_s17 }
  0xcf   : > { %v454_v52 = vmul.f32 %v452_v45, %v452_v45 }
  0xd0   : > { %v506_v54 = vmul.f32 %v504_v49, %v504_v49  ;;  %v532_v58 = vmul.f32 %v530_v53, %v530_v53 }
  0xd1   : > { %v602_v55 = vadd.f32 %v601_v50, %v454_v52  ;;  %v611_v56 = vadd.f32 %v480_v51, %v454_v52 }
  0xd2   : > { %v621_v2 = vadd.f32 %v532_v58, %v506_v54 }
  0xd3   : > { %v612_v57 = vadd.f32 %v611_v56, %v506_v54  ;;  %v603_v59 = vadd.f32 %v602_v55, %v480_v51 }
  0xd4   : > { %v555_v60 = vpop.f32.mrf.mxu2 }
  0xd5   : > { %v556_v61 = vadd.f32 %v886_v17, %v555_v60  ;;  %v581_v62 = vpop.f32.mrf.mxu3  ;;  %v604_v63 = vmul.f32 0.25, %v603_v59  ;;  %v613_v0 = vadd.f32 %v612_v57, %v532_v58 }
  0xd6   : > { %v582_v1 = vadd.f32 %v886_v17, %v581_v62  ;;  %v642_v17 = vld [vmem:[#allocation6 + $0x38] sm:$0xff] }
  0xd7   : > { %v558_v3 = vmul.f32 %v556_v61, %v556_v61  ;;  %606 = vrot.lane.b32.xlu0 %v604_v63, %s1028_s23  ;;  %v614_v4 = vmul.f32 0.25, %v613_v0  ;;  %663 = vmatpush.msra.mxu0 %v642_v17 }
  0xd8   : > { %v584_v5 = vmul.f32 %v582_v1, %v582_v1 }
  0xd9   : > { %v622_v6 = vadd.f32 %v621_v2, %v558_v3  ;;  %616 = vrot.lane.b32.xlu1 %v614_v4, %s1029_s14  ;;  %664 = vmatpush.msra.mxu0 %v641_v18  ;;  %s970_s14 = scalar_lea.hbm %s1263_s5, 16 }
  0xda   : > { %p972_p9 = scmp.lt.s32.totalorder %s970_s14, %s966_s22 }
  0xdb   : > { %v623_v7 = vadd.f32 %v622_v6, %v584_v5  ;;  %665 = vmatpush.msra.mxu0 %v640_v19 }
  0xdc   : > { %p973_p2 = por %p972_p9, %p971_p11 }
  0xdd   : > { %v624_v8 = vmul.f32 0.25, %v623_v7  ;;  %666 = vmatpush.msra.mxu0 %v639_v20 }
  0xde   : > { %p974_p10 = pnand %p973_p2, %p969_p8 }
  0xdf   : > { %667 = vmatpush.msra.mxu0 %v638_v21 }
  0xe1   : > { %626 = vrot.lane.b32.xlu1 %v624_v8, %s1030_s16  ;;  %668 = vmatpush.msra.mxu0 %v637_v22 }
  0xe3   : > { %669 = vmatpush.msra.mxu0 %v636_v24 }
  0xe5   : > { %670 = vmatpush.msra.mxu0 %v635_v25 }
 0x140   : > { %v597_v23 = vpop.permute.xlu0 %596 }
 0x141   : > { %600 = vst.msk [vmem:[#allocation2] sm:$0xff] %vm599_vm3, %v597_v23 }
 0x149   : > { %v607_v26 = vpop.permute.xlu0 %606 }
 0x14a   : > { %610 = vst.msk [vmem:[#allocation2] sm:$0xff] %vm609_vm4, %v607_v26 }
 0x14b   : > { %v617_v27 = vpop.permute.xlu1 %616 }
 0x14c   : > { %620 = vst.msk [vmem:[#allocation2] sm:$0xff] %vm619_vm5, %v617_v27 }
 0x153   : > { %v627_v28 = vpop.permute.xlu1 %626 }
 0x154   : > { %630 = vst.msk [vmem:[#allocation2] sm:$0xff] %vm629_vm6, %v627_v28 }
 0x15b   : > { %v631_v29 = vld [vmem:[#allocation2] sm:$0xff] }
 0x15c   : > { %v632_v30 = vmax.f32 %v631_v29, 1e-06 }
 0x15e   : > { %888 = vlog2.f32 %v632_v30 }
 0x164   : > { %v889_v31 = vpop.eup %888 }
 0x165   : > { %v634_v32 = vmul.f32 0.6931472, %v889_v31 }
 0x167   : > { %671 = vmatmul.f32.vlgmr.msra.gmra.mxu0 %v634_v32 }
 0x1e4   : > { %v672_v34 = vpop.f32.mrf.mxu0 }
 0x1e5   : > { %v673_v35 = vadd.f32 %v887_v33, %v672_v34 }
 0x1e7   : > { %675 = vst [vmem:[%s260_s6] sm:$0xff] %v673_v35 }
 0x1e8   : > { %977 = shalt.err (!%p974_p10)
}
 0x1e9   : > { %827 = dma.vmem_to_hbm [thread:$0]  (%p1131_p7), %s690_s24, 128, %s692_s10, %s677_s11  }
 0x1ea PF: > { %s703_s30 = sand.u32 1, %s1008_s18   ;;  %p1275_p12 = scmp.ge.s32.totalorder %s1020_s21, 2 }
 0x1eb   : > { %s704_s3 = scalar_lea.sflag [#allocation5], %s703_s30 }
 0x1ec   : > { %p838_p13 = pnand %p1275_p12, %p1096_p6 }
 0x1ee   : > { %p839_p0 = pneg %p838_p13 }
 0x1f0   : > { %1003 = dma.done.wait (%p839_p0), %s704_s3, 128  }
 0x1f1   : > { %1005 = vsyncadd (%p839_p0), %s704_s3, 4294967168  ;;  %p19_p3 = scmp.ge.s32.totalorder %s1114_s7, 4   ;;  %s1276_s18 = smov %s1012_s19 }
 0x1f2   : > { %s1277_s19 = smov %s1016_s20  ;;  %s1278_s20 = smov %s1127_s12 }
 0x1f3   : > { %s1279_s21 = smov %s1114_s7  ;;  %21 = sbr.rel (!%p19_p3) target bundleno = 8 (0x8), region = 100 }
 0x1f8   :  { %710 = vsyncpa [#allocation4], 1 }
 0x1f9   :  { %712 = vsyncpa [#allocation4 + $0x1], 1 }
 0x1fa   :  { %713 = vsyncpa [#allocation7], 1 }
 0x1fb   :  { %714 = vsyncpa [#allocation5], 1 }
 0x1fc   :  { %716 = vsyncpa [#allocation5 + $0x1], 1 }

</bundles_post_ra>
